<compile_context>
chip_gen: v6e
topology: v6e:2x2x1
jax: 0.10.0
libtpu: 0.0.40
codegen_flags: <defaults>
</compile_context>

<pallas_src>
import jax
import jax.numpy as jnp
from jax.experimental import pallas as pl
from jax.experimental.pallas import tpu as pltpu


def _make_smape_kernel(B, T, TM, TN, acc_rows):
    need_row_mask = (B % TM) != 0
    need_col_mask = (T % TN) != 0

    def kernel(f_ref, t_ref, o_ref, acc_ref):
        j = pl.program_id(1)
        nj = pl.num_programs(1)

        # Keep all arithmetic in f32 (v5e has no bf16 VPU/EUP; HBM traffic is
        # fixed by the input dtype anyway).
        f = f_ref[...].astype(jnp.float32)
        t = t_ref[...].astype(jnp.float32)

        num = jnp.abs(f - t)
        den = jnp.abs(f) + jnp.abs(t)
        nonzero = den > 0.0
        # divide_no_nan: zero denominator (the 0/0 case) -> 0, without ever
        # generating NaN/Inf and filtering afterwards.
        ratio = jnp.where(nonzero, num / jnp.where(nonzero, den, 1.0), 0.0)

        # Mask out padded rows/columns of edge tiles (only emitted when the
        # array is not an exact multiple of the tile shape).
        if need_row_mask or need_col_mask:
            valid = None
            if need_row_mask:
                rows = (jax.lax.broadcasted_iota(jnp.int32, (TM, TN), 0)
                        + pl.program_id(0) * TM)
                valid = rows < B
            if need_col_mask:
                cols = (jax.lax.broadcasted_iota(jnp.int32, (TM, TN), 1)
                        + j * TN)
                cmask = cols < T
                valid = cmask if valid is None else jnp.logical_and(valid, cmask)
            ratio = jnp.where(valid, ratio, 0.0)

        # Fold the (TM, TN) tile into the (acc_rows, TN) accumulator using a
        # layout-preserving major-axis split -> pure VPU adds, no XLU per tile.
        if TM != acc_rows:
            partial = ratio.reshape(TM // acc_rows, acc_rows, TN).sum(axis=0)
        else:
            partial = ratio

        @pl.when(j == 0)
        def _():
            acc_ref[...] = jnp.zeros_like(acc_ref)

        acc_ref[...] += partial

        # Single cross-lane/sublane reduction per row-block, at the last
        # column step; write the partial sum scalar to SMEM.
        @pl.when(j == nj - 1)
        def _():
            o_ref[0, 0] = jnp.sum(acc_ref[...])

    return kernel


def smape_loss(forecast: jax.Array, target: jax.Array,
               *, tm_cap: int = 256, tn_cap: int = 2048) -> jax.Array:
    """sMAPE loss. forecast, target: (batch, time). Returns scalar float32."""
    assert forecast.shape == target.shape
    B, T = forecast.shape

    # Tile shape: must be (8,128)-divisible or equal to the full array dims.
    TM = B if B <= tm_cap else tm_cap   # tm_cap is a multiple of 8 (and 16)
    TN = T if T <= tn_cap else tn_cap   # tn_cap is a multiple of 128

    # Accumulator rows: 8 sublanes when the tile rows fold cleanly, else TM.
    acc_rows = 8 if (TM % 8 == 0 and TM > 8) else TM

    grid_i = pl.cdiv(B, TM)
    grid_j = pl.cdiv(T, TN)

    kernel = _make_smape_kernel(B, T, TM, TN, acc_rows)

    partials = pl.pallas_call(
        kernel,
        out_shape=jax.ShapeDtypeStruct((grid_i, 1), jnp.float32),
        grid=(grid_i, grid_j),
        in_specs=[
            pl.BlockSpec((TM, TN), lambda i, j: (i, j)),
            pl.BlockSpec((TM, TN), lambda i, j: (i, j)),
        ],
        out_specs=pl.BlockSpec((1, 1), lambda i, j: (i, 0),
                               memory_space=pltpu.SMEM),
        scratch_shapes=[pltpu.VMEM((acc_rows, TN), jnp.float32)],
        compiler_params=pltpu.CompilerParams(
            dimension_semantics=("parallel", "arbitrary")),
    )(forecast, target)

    # Finalize: sum the tiny per-row-block partials and scale by 200 / (B*T).
    return (200.0 / (B * T)) * jnp.sum(partials)


def _smape_ref(forecast, target):
    num = jnp.abs(forecast - target)
    den = jnp.abs(forecast) + jnp.abs(target)
    ratio = num / den
    ratio = jnp.where(jnp.isfinite(ratio), ratio, 0.0)
    return 200.0 * jnp.mean(ratio)


if __name__ == "__main__":
    key = jax.random.PRNGKey(0)
    k1, k2 = jax.random.split(key)

    # Small case matching the module's (batch, time) layout.
    B, T = 2, 8
    forecast = jax.random.normal(k1, (B, T), dtype=jnp.float32)
    target = jax.random.normal(k2, (B, T), dtype=jnp.float32)
    # Inject a 0/0 case to exercise the divide_no_nan path.
    forecast = forecast.at[0, 0].set(0.0)
    target = target.at[0, 0].set(0.0)

    loss = smape_loss(forecast, target)
    jax.block_until_ready(loss)
    ref = _smape_ref(forecast, target)
    assert jnp.allclose(loss, ref, rtol=1e-5, atol=1e-5), (loss, ref)

    # Larger case exercising the tiled, pipelined path with edge-tile masking
    # (B % TM != 0 and T % TN != 0).
    k3, k4 = jax.random.split(k2)
    B2, T2 = 300, 3000
    f2 = jax.random.normal(k3, (B2, T2), dtype=jnp.float32)
    t2 = jax.random.normal(k4, (B2, T2), dtype=jnp.float32)
    f2 = f2.at[5, 7].set(0.0)
    t2 = t2.at[5, 7].set(0.0)

    loss2 = smape_loss(f2, t2)
    jax.block_until_ready(loss2)
    ref2 = _smape_ref(f2, t2)
    assert jnp.allclose(loss2, ref2, rtol=1e-4, atol=1e-5), (loss2, ref2)

    print("KERNEL_OK")
</pallas_src>

<mosaic_0001>
module attributes {stable_mosaic.version = 11 : i64} {
  func.func @kernel(%arg0: i32, %arg1: i32, %arg2: memref<2x8xf32, #tpu.memory_space<vmem>>, %arg3: memref<2x8xf32, #tpu.memory_space<vmem>>, %arg4: memref<1x1xf32, #tpu.memory_space<smem>>, %arg5: memref<2x8xf32, #tpu.memory_space<vmem>>) attributes {dimension_semantics = [#tpu.dimension_semantics<parallel>, #tpu.dimension_semantics<arbitrary>], iteration_bounds = array<i64: 1, 1>, scalar_prefetch = 0 : i64, scratch_operands = 1 : i64, tpu.core_type = #tpu.core_type<tc>, window_params = [{transform_indices = @transform_0, window_bounds = array<i64: 2, 8>}, {transform_indices = @transform_1, window_bounds = array<i64: 2, 8>}, {transform_indices = @transform_2, window_bounds = array<i64: 1, 1>}]} {
    %c0 = arith.constant 0 : index
    %c0_0 = arith.constant 0 : index
    %0 = vector.load %arg2[%c0, %c0_0] : memref<2x8xf32, #tpu.memory_space<vmem>>, vector<2x8xf32>
    %c0_1 = arith.constant 0 : index
    %c0_2 = arith.constant 0 : index
    %1 = vector.load %arg3[%c0_1, %c0_2] : memref<2x8xf32, #tpu.memory_space<vmem>>, vector<2x8xf32>
    %2 = arith.subf %0, %1 : vector<2x8xf32>
    %3 = math.absf %2 : vector<2x8xf32>
    %4 = math.absf %0 : vector<2x8xf32>
    %5 = math.absf %1 : vector<2x8xf32>
    %6 = arith.addf %4, %5 : vector<2x8xf32>
    %cst = arith.constant 0.000000e+00 : f32
    %7 = vector.broadcast %cst : f32 to vector<2x8xf32>
    %8 = arith.cmpf ogt, %6, %7 : vector<2x8xf32>
    %cst_3 = arith.constant 1.000000e+00 : f32
    %9 = vector.broadcast %cst_3 : f32 to vector<2x8xf32>
    %10 = arith.select %8, %6, %9 : vector<2x8xi1>, vector<2x8xf32>
    %11 = arith.divf %3, %10 : vector<2x8xf32>
    %cst_4 = arith.constant 0.000000e+00 : f32
    %12 = vector.broadcast %cst_4 : f32 to vector<2x8xf32>
    %13 = arith.select %8, %11, %12 : vector<2x8xi1>, vector<2x8xf32>
    %c0_i32 = arith.constant 0 : i32
    %14 = arith.cmpi eq, %arg1, %c0_i32 : i32
    %15 = arith.extui %14 : i1 to i32
    %c0_i32_5 = arith.constant 0 : i32
    %16 = arith.cmpi ne, %15, %c0_i32_5 : i32
    scf.if %16 {
      %cst_12 = arith.constant 0.000000e+00 : f32
      %23 = vector.broadcast %cst_12 : f32 to vector<2x8xf32>
      %c0_13 = arith.constant 0 : index
      %c0_14 = arith.constant 0 : index
      %24 = vector.load %arg5[%c0_13, %c0_14] : memref<2x8xf32, #tpu.memory_space<vmem>>, vector<2x8xf32>
      tpu.vector_store %arg5[%c0_13, %c0_14], %23 {strides = array<i32>} : memref<2x8xf32, #tpu.memory_space<vmem>>, vector<2x8xf32>,
    } else {
    }
    %c0_6 = arith.constant 0 : index
    %c0_7 = arith.constant 0 : index
    %17 = vector.load %arg5[%c0_6, %c0_7] : memref<2x8xf32, #tpu.memory_space<vmem>>, vector<2x8xf32>
    %18 = arith.addf %17, %13 : vector<2x8xf32>
    %c0_8 = arith.constant 0 : index
    %c0_9 = arith.constant 0 : index
    %19 = vector.load %arg5[%c0_8, %c0_9] : memref<2x8xf32, #tpu.memory_space<vmem>>, vector<2x8xf32>
    tpu.vector_store %arg5[%c0_8, %c0_9], %18 {strides = array<i32>} : memref<2x8xf32, #tpu.memory_space<vmem>>, vector<2x8xf32>,
    %c0_i32_10 = arith.constant 0 : i32
    %20 = arith.cmpi eq, %arg1, %c0_i32_10 : i32
    %21 = arith.extui %20 : i1 to i32
    %c0_i32_11 = arith.constant 0 : i32
    %22 = arith.cmpi ne, %21, %c0_i32_11 : i32
    scf.if %22 {
      %c0_12 = arith.constant 0 : index
      %c0_13 = arith.constant 0 : index
      %23 = vector.load %arg5[%c0_12, %c0_13] : memref<2x8xf32, #tpu.memory_space<vmem>>, vector<2x8xf32>
      %24 = vector.shape_cast %23 : vector<2x8xf32> to vector<1x2x8xf32>
      %cst_14 = arith.constant dense<0.000000e+00> : vector<1xf32>
      %25 = vector.multi_reduction <add>, %24, %cst_14 [1, 2] : vector<1x2x8xf32> to vector<1xf32>
      %26 = vector.shape_cast %25 : vector<1xf32> to vector<1x1x1xf32>
      %27 = vector.extract %26[0, 0, 0] : f32 from vector<1x1x1xf32>
      %c0_15 = arith.constant 0 : index
      %c0_16 = arith.constant 0 : index
      %28 = memref.load %arg4[%c0_15, %c0_16] : memref<1x1xf32, #tpu.memory_space<smem>>
      memref.store %27, %arg4[%c0_15, %c0_16] : memref<1x1xf32, #tpu.memory_space<smem>>
    } else {
    }
    return
  }
  func.func @transform_0(%arg0: i32, %arg1: i32) -> (i32, i32) {
    %c0_i32 = arith.constant 0 : i32
    return %arg0, %arg1 : i32, i32
  }
  func.func @transform_1(%arg0: i32, %arg1: i32) -> (i32, i32) {
    %c0_i32 = arith.constant 0 : i32
    return %arg0, %arg1 : i32, i32
  }
  func.func @transform_2(%arg0: i32, %arg1: i32) -> (i32, i32) {
    %c0_i32 = arith.constant 0 : i32
    %c0_i32_0 = arith.constant 0 : i32
    return %arg0, %c0_i32 : i32, i32
  }
}

</mosaic_0001>

<bundles_post_ra>
// kernel: tpu_custom_call.1
= control target key start
LH: loop header
LB: loop body
LE: loop exit
PB: predicated region body
PF: predicated region fallthrough
CT: control target
= control target key end

     0   :  { %7 = vsyncpa [#allocation4], 0  ;;  %s182_s0 = inlined_call_operand.hbm [shape: f32[2,8], index: 0, kind: input, shape index: {}]   ;;  %s183_s1 = inlined_call_operand.hbm [shape: f32[2,8], index: 1, kind: input, shape index: {}]   ;;  %s184_s2 = inlined_call_operand.hbm [shape: f32[1,1], index: 2, kind: output, shape index: {}]  }
   0x1   :  { %8 = vsyncpa [#allocation7], 0 }
   0x2   :  { %9 = vsyncpa [#allocation5], 0  ;;  %s151_s9 = smov [#allocation3]   ;;  %s152_s11 = smov [#allocation6]  }
   0x3   :  { %s16_s10 = sshll.u32 %s151_s9, 4  ;;  %s26_s12 = sshll.u32 %s152_s11, 4  ;;  %s17_s10 = int_to_ptr.vmem [resolvable:$true] %s16_s10  ;;  %s27_s12 = int_to_ptr.vmem [resolvable:$true] %s26_s12 }
   0x4   :  { %s105_s13 = scalar_lea.vmem %s17_s10, 32  ;;  %p110_p1 = scmp.lt.s32.totalorder %s17_s10, %s17_s10 }
   0x5   :  { %p106_p0 = scmp.ne.s32.totalorder %s17_s10, %s105_s13  ;;  %p111_p2 = scmp.lt.s32.totalorder %s105_s13, %s105_s13 }
   0x7   :  { %p112_p3 = por %p111_p2, %p110_p1 }
   0x9   :  { %p113_p4 = pnand %p112_p3, %p106_p0 }
   0xb   :  { %116 = shalt.err (!%p113_p4)
}
   0xc   :  { %19 = dma.hbm_to_vmem [thread:$0]  %s182_s0, 32, %s17_s10, [#allocation4]  }
   0xd   :  { %s125_s16 = scalar_lea.vmem %s27_s12, 32  ;;  %p130_p6 = scmp.lt.s32.totalorder %s27_s12, %s27_s12 }
   0xe   :  { %p126_p5 = scmp.ne.s32.totalorder %s27_s12, %s125_s16  ;;  %p131_p7 = scmp.lt.s32.totalorder %s125_s16, %s125_s16 }
  0x10   :  { %p132_p8 = por %p131_p7, %p130_p6 }
  0x12   :  { %p133_p9 = pnand %p132_p8, %p126_p5 }
  0x14   :  { %136 = shalt.err (!%p133_p9)
}
  0x15   :  { %29 = dma.hbm_to_vmem [thread:$0]  %s183_s1, 32, %s27_s12, [#allocation7]  }
  0x16   :  { %145 = dma.done.wait [#allocation4], 32  }
  0x17   :  { %146 = vsyncadd [#allocation4], 4294967264 }
  0x18   :  { %147 = dma.done.wait [#allocation7], 32  }
  0x19   :  { %148 = vsyncadd [#allocation7], 4294967264  ;;  %vm52_vm0 = vcmask 58368   ;;  %v153_v0 = vmov 0.0   ;;  %v36_v1 = vld [vmem:[#allocation3] sm:$0x3] }
  0x1a   :  { %53 = vst.msk [vmem:[#allocation2] sm:$0x3] %vm52_vm0, %v153_v0  ;;  %v37_v2 = vld [vmem:[#allocation6] sm:$0x3]  ;;  %v40_v3 = vand.u32 2147483647, %v36_v1 }
  0x1b   :  { %v41_v4 = vand.u32 2147483647, %v37_v2  ;;  %v38_v7 = vsub.f32 %v36_v1, %v37_v2  ;;  %s154_s1 = smov [#allocation8]  }
  0x1d   :  { %v42_v5 = vadd.f32 %v41_v4, %v40_v3  ;;  %v39_v8 = vand.u32 2147483647, %v38_v7 }
  0x1f   :  { %vm43_vm1 = vcmp.gt.f32.partialorder %v42_v5, 0.0 }
  0x20   :  { %v44_v6 = vsel %vm43_vm1, %v42_v5, 1.0 }
  0x21   :  { %95 = vrcp.f32 %v44_v6  ;;  %v54_v11 = vld [vmem:[#allocation2] sm:$0x3] }
  0x2e   :  { %v96_v9 = vpop.eup %95 }
  0x2f   :  { %v46_v10 = vmul.f32 %v96_v9, %v39_v8 }
  0x31   :  { %v47_v12 = vsel %vm43_vm1, %v46_v10, 0.0 }
  0x32   :  { %v55_v13 = vadd.f32 %v54_v11, %v47_v12 }
  0x34   :  { %57 = vst.msk [vmem:[#allocation2] sm:$0x3] %vm52_vm0, %v55_v13 }
  0x3b   :  { %v61_v14 = vld [vmem:[#allocation2] sm:$0x3] }
  0x3c   :  { %v62_v15 = vsel %vm52_vm0, %v61_v14, 0.0 }
  0x3d   :  { %63 = vadd.xlane.f32.xlu0 %v62_v15 }
  0xc6   :  { %v64_v16 = vpop.xlane.xlu0 %63 }
  0xc7   :  { %v65_v17 = vrot.slane %v64_v16, 4 }
  0xc9   :  { %v66_v18 = vadd.f32 %v65_v17, %v64_v16 }
  0xcb   :  { %v67_v19 = vrot.slane %v66_v18, 2 }
  0xcd   :  { %v68_v20 = vadd.f32 %v67_v19, %v66_v18 }
  0xcf   :  { %v69_v21 = vrot.slane %v68_v20, 1 }
  0xd1   :  { %v70_v22 = vadd.f32 %v69_v21, %v68_v20 }
  0xd3   :  { %89 = vpush %v70_v22 }
 0x104   :  { %s90_s0 = spop %89 }
 0x105   :  { %73 = sst [smem:[#allocation8]] %s90_s0 }
 0x106   :  { %81 = dma.smem_to_hbm %s154_s1, 16, %s184_s2, [#allocation5]  }
 0x107   :  { %149 = dma.done.wait [#allocation5], 16  }
 0x108   :  { %150 = vsyncadd [#allocation5], 4294967280 }
 0x109   :  { %85 = sfence }
 0x10a   :  { %86 = vsyncpa [#allocation4], 1 }
 0x10b   :  { %87 = vsyncpa [#allocation7], 1 }
 0x10c   :  { %88 = vsyncpa [#allocation5], 1 }

</bundles_post_ra>
